<compile_context>
chip_gen: v6e
topology: v6e:2x2x1
jax: 0.10.0
libtpu: 0.0.40
codegen_flags: <defaults>
</compile_context>

<pallas_src>
import functools

import jax
import jax.numpy as jnp
from jax.experimental import pallas as pl
from jax.experimental.pallas import tpu as pltpu


def _round_up(a, m):
    return (a + m - 1) // m * m


def gap_kernel(batch_row_ref, x_ref, w_ref, out_ref, *scratch,
               d_real, use_ones_col):
    """Two-phase GraphAttentionPooling kernel over the node axis."""
    if use_ones_col:
        sum_acc, tg_acc = scratch
        cnt_acc = None
    else:
        sum_acc, tg_acc, cnt_acc = scratch

    phase = pl.program_id(0)
    j = pl.program_id(1)
    nj = pl.num_programs(1)

    g_pad = out_ref.shape[0]
    tn = x_ref.shape[0]

    x = x_ref[...]                            # (tn, D_pad), native dtype
    b_row = batch_row_ref[...]                # (1, tn) int32; padded rows -> g_pad

    # (G_pad, tn) membership mask from a VPU iota/compare (no transpose, no
    # second one-hot).  Shared by both phases.
    gid = jax.lax.broadcasted_iota(jnp.int32, (g_pad, tn), 0)
    mask = gid == b_row

    # ------------- phase 0: scatter-sum (+counts) and tg = tanh(mean @ W) ----
    @pl.when(phase == 0)
    def _accumulate():
        @pl.when(j == 0)
        def _init():
            sum_acc[...] = jnp.zeros_like(sum_acc)
            # Resident output block: zero it here so phase 1 only accumulates.
            out_ref[...] = jnp.zeros_like(out_ref)
            if cnt_acc is not None:
                cnt_acc[...] = jnp.zeros_like(cnt_acc)

        onehot = mask.astype(x.dtype)                       # (G_pad, tn)
        sum_acc[...] += jnp.dot(onehot, x,
                                preferred_element_type=jnp.float32)
        if cnt_acc is not None:
            # Fallback only when D is already lane-aligned (no spare column).
            cnt_acc[...] += jnp.sum(mask.astype(jnp.float32), axis=1,
                                    keepdims=True)

        @pl.when(j == nj - 1)
        def _finalize_mean():
            s = sum_acc[...]                                # (G_pad, D_pad) f32
            if use_ones_col:
                # Counts were folded into the padded ones-column of x.
                counts = s[:, d_real:d_real + 1]            # (G_pad, 1)
            else:
                counts = cnt_acc[...]
            # Counts exact in f32 up to 2^24 nodes per group.
            mean = s / jnp.maximum(counts, 1.0)
            tg_acc[...] = jnp.tanh(
                jnp.dot(mean.astype(w_ref.dtype), w_ref[...],
                        preferred_element_type=jnp.float32))

    # ------------- phase 1: attention coefficients scale the one-hot ---------
    @pl.when(phase == 1)
    def _scatter():
        tg = tg_acc[...].astype(x.dtype)                    # (G_pad, D_pad)
        # Scores for every (group, node): contraction over D on the MXU.
        s_gn = jax.lax.dot_general(tg, x, (((1,), (1,)), ((), ())),
                                   preferred_element_type=jnp.float32)
        # Each node belongs to exactly one group -> masked sublane reduce.
        score = jnp.sum(jnp.where(mask, s_gn, 0.0), axis=0, keepdims=True)
        coefs = jax.nn.sigmoid(score * 10.0)                # (1, tn)
        # Scale the one-hot by the coefficient (padded nodes have an all-False
        # column -> contribute nothing), then a single scatter-add matmul.
        scaled = jnp.where(mask, coefs, 0.0).astype(x.dtype)   # (G_pad, tn)
        out_ref[...] += jnp.dot(scaled, x,
                                preferred_element_type=jnp.float32)


def graph_attention_pooling(x, batch, weight, size, tile_n=None):
    """x: (N, D), batch: (N,) int, weight: (D, D) -> (size, D) float32."""
    N, D = x.shape
    G = int(size)
    itemsize = jnp.dtype(x.dtype).itemsize
    min_sub = {4: 8, 2: 16, 1: 32}.get(itemsize, 8)   # dtype-aware sublane tile

    D_pad = _round_up(D, 128)                # lane-dense feature dim
    G_pad = _round_up(max(G, 1), 8)          # sublane-aligned group dim
    use_ones_col = D < D_pad                 # spare padded column carries counts

    # ---- node-axis tiling ----------------------------------------------------
    if tile_n is not None:
        # Test/override path: force the multi-tile pipeline at small N.
        assert tile_n % 128 == 0, "tile_n override must be a multiple of 128"
        tn = tile_n
    else:
        single_tile_budget = 8 * 1024 * 1024
        n_aligned = _round_up(max(N, min_sub), min_sub)
        if n_aligned * D_pad * itemsize <= single_tile_budget:
            # Single-tile fast path: constant x block index across both phases
            # -> x is fetched from HBM once.
            tn = n_aligned
        else:
            # ~2 MiB x block, multiple of 128 so the batch row block stays
            # lane-aligned.
            tn = (2 * 1024 * 1024) // (D_pad * itemsize)
            tn = max(128, min(2048, (tn // 128) * 128))
    N_pad = _round_up(max(N, tn), tn)
    num_tiles = N_pad // tn

    # ---- inputs: pad only when actually needed (padding is extra HBM traffic)
    if D == D_pad and N == N_pad:
        x_in = x
    else:
        x_in = jnp.zeros((N_pad, D_pad), x.dtype).at[:N, :D].set(x)
        if use_ones_col:
            x_in = x_in.at[:N, D].set(1.0)   # counts column for the scatter-sum

    if D == D_pad:
        w_in = weight
    else:
        w_in = jnp.zeros((D_pad, D_pad), weight.dtype).at[:D, :D].set(weight)

    batch_i32 = batch.astype(jnp.int32)
    if N == N_pad:
        batch_row = batch_i32.reshape(1, N_pad)
    else:
        # Padded nodes get an out-of-range group id -> all-zero one-hot column.
        batch_row = jnp.full((1, N_pad), G_pad, jnp.int32).at[0, :N].set(batch_i32)

    # ---- VMEM budget (double-buffered inputs/outputs + scratch) --------------
    w_itemsize = jnp.dtype(weight.dtype).itemsize
    vmem_bytes = (
        2 * tn * D_pad * itemsize            # x blocks
        + 2 * 8 * tn * 4                     # batch-row blocks (sublane padded)
        + 2 * D_pad * D_pad * w_itemsize     # weight (constant block)
        + 2 * G_pad * D_pad * 4              # resident output block
        + 2 * G_pad * D_pad * 4              # sum_acc + tg_acc scratch
        + G_pad * 128 * 4                    # cnt_acc (lane padded), if present
    )
    vmem_limit = int(min(100 * 1024 * 1024, max(8 * 1024 * 1024, 2 * vmem_bytes)))

    scratch_shapes = [
        pltpu.VMEM((G_pad, D_pad), jnp.float32),   # sum accumulator
        pltpu.VMEM((G_pad, D_pad), jnp.float32),   # tg = tanh(mean @ W)
    ]
    if not use_ones_col:
        scratch_shapes.append(pltpu.VMEM((G_pad, 1), jnp.float32))  # counts

    kernel = functools.partial(gap_kernel, d_real=D, use_ones_col=use_ones_col)

    out_pad = pl.pallas_call(
        kernel,
        out_shape=jax.ShapeDtypeStruct((G_pad, D_pad), jnp.float32),
        grid=(2, num_tiles),                 # (phase, node-tile)
        in_specs=[
            pl.BlockSpec((1, tn), lambda p, j: (0, j)),           # batch row
            pl.BlockSpec((tn, D_pad), lambda p, j: (j, 0)),       # x tile
            pl.BlockSpec((D_pad, D_pad), lambda p, j: (0, 0)),    # weight
        ],
        out_specs=pl.BlockSpec((G_pad, D_pad), lambda p, j: (0, 0)),
        scratch_shapes=scratch_shapes,
        compiler_params=pltpu.CompilerParams(
            dimension_semantics=("arbitrary", "arbitrary"),
            vmem_limit_bytes=vmem_limit,
        ),
    )(batch_row, x_in, w_in)

    return out_pad[:G, :D]


def reference(x, batch, weight, size):
    """Pure-JAX reference of the PyTorch forward."""
    x32 = x.astype(jnp.float32)
    onehot = (batch[None, :] == jnp.arange(size)[:, None]).astype(jnp.float32)
    counts = onehot.sum(axis=1, keepdims=True)
    mean = (onehot @ x32) / jnp.maximum(counts, 1.0)
    tg = jnp.tanh(mean @ weight.astype(jnp.float32))
    coefs = jax.nn.sigmoid((x32 * tg[batch] * 10.0).sum(axis=1))
    return onehot @ (coefs[:, None] * x32)


def _run_case(key, N, D, G, tile_n=None):
    k_x, k_w, k_b = jax.random.split(key, 3)
    x = jax.random.normal(k_x, (N, D), dtype=jnp.float32)
    weight = jax.random.normal(k_w, (D, D), dtype=jnp.float32) / jnp.sqrt(D)
    batch = jnp.sort(jax.random.randint(k_b, (N,), 0, G, dtype=jnp.int32))
    out = jax.block_until_ready(
        graph_attention_pooling(x, batch, weight, G, tile_n=tile_n))
    ref = reference(x, batch, weight, G)
    assert out.shape == (G, D), (out.shape, (G, D))
    assert jnp.allclose(out, ref, atol=1e-4, rtol=1e-4), \
        f"mismatch N={N} D={D} G={G}: max err {jnp.abs(out - ref).max()}"


if __name__ == "__main__":
    root = jax.random.PRNGKey(0)
    k0, k1, k2, k3 = jax.random.split(root, 4)

    # Small module-typical shapes: ones-column counts + single-tile fast path.
    _run_case(k0, N=16, D=32, G=4)
    # Lane-aligned D and N: full input pass-through + cnt_acc fallback.
    _run_case(k1, N=64, D=128, G=5)
    # Forced multi-tile pipeline (padding + ones-column path) at small shapes.
    _run_case(k2, N=400, D=96, G=12, tile_n=128)
    # Forced multi-tile with aligned D (cnt_acc across tiles, padded rows).
    _run_case(k3, N=300, D=128, G=7, tile_n=128)

    print("KERNEL_OK")
</pallas_src>

<mosaic_0001>
module attributes {stable_mosaic.version = 11 : i64} {
  func.func @gap_kernel(%arg0: i32, %arg1: i32, %arg2: memref<1x16xi32, #tpu.memory_space<vmem>>, %arg3: memref<16x128xf32, #tpu.memory_space<vmem>>, %arg4: memref<128x128xf32, #tpu.memory_space<vmem>>, %arg5: memref<8x128xf32, #tpu.memory_space<vmem>>, %arg6: memref<8x128xf32, #tpu.memory_space<vmem>>, %arg7: memref<8x128xf32, #tpu.memory_space<vmem>>) attributes {dimension_semantics = [#tpu.dimension_semantics<arbitrary>, #tpu.dimension_semantics<arbitrary>], iteration_bounds = array<i64: 2, 1>, scalar_prefetch = 0 : i64, scratch_operands = 2 : i64, tpu.core_type = #tpu.core_type<tc>, window_params = [{transform_indices = @transform_0, window_bounds = array<i64: 1, 16>}, {transform_indices = @transform_1, window_bounds = array<i64: 16, 128>}, {pipeline_mode = #tpu.pipeline_mode<synchronous>, transform_indices = @transform_2, window_bounds = array<i64: 128, 128>}, {pipeline_mode = #tpu.pipeline_mode<synchronous>, transform_indices = @transform_3, window_bounds = array<i64: 8, 128>}]} {
    %c0 = arith.constant 0 : index
    %c0_0 = arith.constant 0 : index
    %0 = vector.load %arg3[%c0, %c0_0] : memref<16x128xf32, #tpu.memory_space<vmem>>, vector<16x128xf32>
    %c0_1 = arith.constant 0 : index
    %c0_2 = arith.constant 0 : index
    %1 = vector.load %arg2[%c0_1, %c0_2] : memref<1x16xi32, #tpu.memory_space<vmem>>, vector<1x16xi32>
    %2 = tpu.iota {dimensions = array<i32: 0>} : vector<8x16xi32>
    %3 = vector.broadcast %1 : vector<1x16xi32> to vector<8x16xi32>
    %4 = arith.cmpi eq, %2, %3 : vector<8x16xi32>
    %c0_i32 = arith.constant 0 : i32
    %5 = arith.cmpi eq, %arg0, %c0_i32 : i32
    %6 = arith.extui %5 : i1 to i32
    %c0_i32_3 = arith.constant 0 : i32
    %7 = arith.cmpi ne, %6, %c0_i32_3 : i32
    scf.if %7 {
      %c0_i32_5 = arith.constant 0 : i32
      %11 = arith.cmpi eq, %arg1, %c0_i32_5 : i32
      %12 = arith.extui %11 : i1 to i32
      %c0_i32_6 = arith.constant 0 : i32
      %13 = arith.cmpi ne, %12, %c0_i32_6 : i32
      scf.if %13 {
        %cst_13 = arith.constant 0.000000e+00 : f32
        %23 = vector.broadcast %cst_13 : f32 to vector<8x128xf32>
        %c0_14 = arith.constant 0 : index
        %c0_15 = arith.constant 0 : index
        %24 = vector.load %arg6[%c0_14, %c0_15] : memref<8x128xf32, #tpu.memory_space<vmem>>, vector<8x128xf32>
        tpu.vector_store %arg6[%c0_14, %c0_15], %23 {strides = array<i32>} : memref<8x128xf32, #tpu.memory_space<vmem>>, vector<8x128xf32>,
        %cst_16 = arith.constant 0.000000e+00 : f32
        %25 = vector.broadcast %cst_16 : f32 to vector<8x128xf32>
        %c0_17 = arith.constant 0 : index
        %c0_18 = arith.constant 0 : index
        %26 = vector.load %arg5[%c0_17, %c0_18] : memref<8x128xf32, #tpu.memory_space<vmem>>, vector<8x128xf32>
        tpu.vector_store %arg5[%c0_17, %c0_18], %25 {strides = array<i32>} : memref<8x128xf32, #tpu.memory_space<vmem>>, vector<8x128xf32>,
      } else {
      }
      %14 = arith.extui %4 : vector<8x16xi1> to vector<8x16xi32>
      %15 = arith.sitofp %14 : vector<8x16xi32> to vector<8x16xf32>
      %c0_7 = arith.constant 0 : index
      %c0_8 = arith.constant 0 : index
      %16 = vector.load %arg6[%c0_7, %c0_8] : memref<8x128xf32, #tpu.memory_space<vmem>>, vector<8x128xf32>
      %cst = arith.constant dense<0.000000e+00> : vector<8x128xf32>
      %17 = tpu.matmul %15, %0, %cst {dimension_numbers = #tpu.dot_dimension_numbers<[1], [0], [0], [1], [0, 0, 1, 1], [], []>} : vector<8x16xf32>, vector<16x128xf32>, vector<8x128xf32> -> vector<8x128xf32>
      %18 = arith.addf %16, %17 : vector<8x128xf32>
      %c0_9 = arith.constant 0 : index
      %c0_10 = arith.constant 0 : index
      %19 = vector.load %arg6[%c0_9, %c0_10] : memref<8x128xf32, #tpu.memory_space<vmem>>, vector<8x128xf32>
      tpu.vector_store %arg6[%c0_9, %c0_10], %18 {strides = array<i32>} : memref<8x128xf32, #tpu.memory_space<vmem>>, vector<8x128xf32>,
      %c0_i32_11 = arith.constant 0 : i32
      %20 = arith.cmpi eq, %arg1, %c0_i32_11 : i32
      %21 = arith.extui %20 : i1 to i32
      %c0_i32_12 = arith.constant 0 : i32
      %22 = arith.cmpi ne, %21, %c0_i32_12 : i32
      scf.if %22 {
        %c0_13 = arith.constant 0 : index
        %c0_14 = arith.constant 0 : index
        %23 = vector.load %arg6[%c0_13, %c0_14] : memref<8x128xf32, #tpu.memory_space<vmem>>, vector<8x128xf32>
        %24 = vector.extract_strided_slice %23 {offsets = [0, 32], sizes = [8, 1], strides = [1, 1]} : vector<8x128xf32> to vector<8x1xf32>
        %cst_15 = arith.constant 1.000000e+00 : f32
        %25 = vector.broadcast %cst_15 : f32 to vector<8x1xf32>
        %26 = arith.maximumf %24, %25 : vector<8x1xf32>
        %27 = vector.broadcast %26 : vector<8x1xf32> to vector<8x128xf32>
        %28 = arith.divf %23, %27 : vector<8x128xf32>
        %c0_16 = arith.constant 0 : index
        %c0_17 = arith.constant 0 : index
        %29 = vector.load %arg4[%c0_16, %c0_17] : memref<128x128xf32, #tpu.memory_space<vmem>>, vector<128x128xf32>
        %cst_18 = arith.constant dense<0.000000e+00> : vector<8x128xf32>
        %30 = tpu.matmul %28, %29, %cst_18 {dimension_numbers = #tpu.dot_dimension_numbers<[1], [0], [0], [1], [0, 0, 1, 1], [], []>} : vector<8x128xf32>, vector<128x128xf32>, vector<8x128xf32> -> vector<8x128xf32>
        %31 = math.tanh %30 : vector<8x128xf32>
        %c0_19 = arith.constant 0 : index
        %c0_20 = arith.constant 0 : index
        %32 = vector.load %arg7[%c0_19, %c0_20] : memref<8x128xf32, #tpu.memory_space<vmem>>, vector<8x128xf32>
        tpu.vector_store %arg7[%c0_19, %c0_20], %31 {strides = array<i32>} : memref<8x128xf32, #tpu.memory_space<vmem>>, vector<8x128xf32>,
      } else {
      }
    } else {
    }
    %c1_i32 = arith.constant 1 : i32
    %8 = arith.cmpi eq, %arg0, %c1_i32 : i32
    %9 = arith.extui %8 : i1 to i32
    %c0_i32_4 = arith.constant 0 : i32
    %10 = arith.cmpi ne, %9, %c0_i32_4 : i32
    scf.if %10 {
      %c0_5 = arith.constant 0 : index
      %c0_6 = arith.constant 0 : index
      %11 = vector.load %arg7[%c0_5, %c0_6] : memref<8x128xf32, #tpu.memory_space<vmem>>, vector<8x128xf32>
      %cst = arith.constant dense<0.000000e+00> : vector<8x16xf32>
      %12 = tpu.matmul %11, %0, %cst {dimension_numbers = #tpu.dot_dimension_numbers<[1], [1], [0], [0], [0, 0, 1, 0], [], []>} : vector<8x128xf32>, vector<16x128xf32>, vector<8x16xf32> -> vector<8x16xf32>
      %cst_7 = arith.constant 0.000000e+00 : f32
      %13 = vector.broadcast %cst_7 : f32 to vector<8x16xf32>
      %14 = arith.select %4, %12, %13 : vector<8x16xi1>, vector<8x16xf32>
      %cst_8 = arith.constant dense<0.000000e+00> : vector<16xf32>
      %15 = vector.multi_reduction <add>, %14, %cst_8 [0] : vector<8x16xf32> to vector<16xf32>
      %16 = vector.shape_cast %15 : vector<16xf32> to vector<1x16xf32>
      %cst_9 = arith.constant 1.000000e+01 : f32
      %17 = vector.broadcast %cst_9 : f32 to vector<1x16xf32>
      %18 = arith.mulf %16, %17 : vector<1x16xf32>
      %19 = arith.negf %18 : vector<1x16xf32>
      %20 = math.exp %19 : vector<1x16xf32>
      %cst_10 = arith.constant 1.000000e+00 : f32
      %21 = vector.broadcast %cst_10 : f32 to vector<1x16xf32>
      %22 = arith.addf %21, %20 : vector<1x16xf32>
      %23 = arith.divf %21, %22 : vector<1x16xf32>
      %cst_11 = arith.constant 0.000000e+00 : f32
      %24 = vector.shape_cast %23 : vector<1x16xf32> to vector<1x16xf32>
      %25 = vector.broadcast %24 : vector<1x16xf32> to vector<8x16xf32>
      %26 = vector.broadcast %cst_11 : f32 to vector<8x16xf32>
      %27 = arith.select %4, %25, %26 : vector<8x16xi1>, vector<8x16xf32>
      %c0_12 = arith.constant 0 : index
      %c0_13 = arith.constant 0 : index
      %28 = vector.load %arg5[%c0_12, %c0_13] : memref<8x128xf32, #tpu.memory_space<vmem>>, vector<8x128xf32>
      %cst_14 = arith.constant dense<0.000000e+00> : vector<8x128xf32>
      %29 = tpu.matmul %27, %0, %cst_14 {dimension_numbers = #tpu.dot_dimension_numbers<[1], [0], [0], [1], [0, 0, 1, 1], [], []>} : vector<8x16xf32>, vector<16x128xf32>, vector<8x128xf32> -> vector<8x128xf32>
      %30 = arith.addf %28, %29 : vector<8x128xf32>
      %c0_15 = arith.constant 0 : index
      %c0_16 = arith.constant 0 : index
      %31 = vector.load %arg5[%c0_15, %c0_16] : memref<8x128xf32, #tpu.memory_space<vmem>>, vector<8x128xf32>
      tpu.vector_store %arg5[%c0_15, %c0_16], %30 {strides = array<i32>} : memref<8x128xf32, #tpu.memory_space<vmem>>, vector<8x128xf32>,
    } else {
    }
    return
  }
  func.func @transform_0(%arg0: i32, %arg1: i32) -> (i32, i32) {
    %c0_i32 = arith.constant 0 : i32
    %c0_i32_0 = arith.constant 0 : i32
    return %c0_i32, %arg1 : i32, i32
  }
  func.func @transform_1(%arg0: i32, %arg1: i32) -> (i32, i32) {
    %c0_i32 = arith.constant 0 : i32
    %c0_i32_0 = arith.constant 0 : i32
    return %arg1, %c0_i32 : i32, i32
  }
  func.func @transform_2(%arg0: i32, %arg1: i32) -> (i32, i32) {
    %c0_i32 = arith.constant 0 : i32
    %c0_i32_0 = arith.constant 0 : i32
    %c0_i32_1 = arith.constant 0 : i32
    return %c0_i32, %c0_i32_0 : i32, i32
  }
  func.func @transform_3(%arg0: i32, %arg1: i32) -> (i32, i32) {
    %c0_i32 = arith.constant 0 : i32
    %c0_i32_0 = arith.constant 0 : i32
    %c0_i32_1 = arith.constant 0 : i32
    return %c0_i32, %c0_i32_0 : i32, i32
  }
}

</mosaic_0001>

<bundles_post_ra>
// kernel: tpu_custom_call.1
= control target key start
LH: loop header
LB: loop body
LE: loop exit
PB: predicated region body
PF: predicated region fallthrough
CT: control target
= control target key end

     0   :  { %8 = vsyncpa [#allocation5], 0  ;;  %s1165_s0 = inlined_call_operand.hbm [shape: s32[1,16], index: 0, kind: input, shape index: {}]   ;;  %s1166_s1 = inlined_call_operand.hbm [shape: f32[16,128], index: 1, kind: input, shape index: {}]   ;;  %s1167_s2 = inlined_call_operand.hbm [shape: f32[128,128], index: 2, kind: input, shape index: {}]   ;;  %s1168_s3 = inlined_call_operand.hbm [shape: f32[8,128], index: 3, kind: output, shape index: {}]  }
   0x1   :  { %9 = vsyncpa [#allocation8], 0 }
   0x2   :  { %10 = vsyncpa [#allocation6], 0  ;;  %s1001_s12 = smov 0   ;;  %s1003_s13 = smov 0  }
   0x3   :  { %s1005_s14 = smov 0  }
   0x4 LB: > { %s970_s15 = smov [#allocation7]   ;;  %s652_s17 = sadd.s32 4294967295, %s968_s14   ;;  %s968_s14 = sphi %s1005_s14, %s16_s14   ;;  %s964_s13 = sphi %s1003_s13, %s1175_s13   ;;  %s960_s12 = sphi %s1001_s12, %s1174_s12  }
   0x5   : > { %s155_s16 = sshll.u32 %s970_s15, 4  ;;  %p653_p0 = scmp.ge.s32.totalorder %s968_s14, 1  ;;  %s156_s16 = int_to_ptr.vmem [resolvable:$true] %s155_s16 }
   0x6   : > { %p127_p1 = scmp.lt.s32.totalorder %s968_s14, 3  ;;  %p1021_p2 = scmp.eq.s32.totalorder %s652_s17, 0 }
   0x7   : > { %s28_s21 = sadd.s32 1, %s964_s13  ;;  %s971_s23 = smov [#allocation4]  }
   0x8   : > { %p1025_p3 = pnand %p653_p0, %p127_p1  ;;  %p1038_p6 = scmp.ge.s32.totalorder %s28_s21, 2 }
   0x9   : > { %s142_s24 = sshll.u32 %s971_s23, 4  ;;  %s843_s25 = scalar_lea.vmem %s156_s16, 256  ;;  %s143_s24 = int_to_ptr.vmem [resolvable:$true] %s142_s24 }
   0xa   : > { %p770_p4 = pneg %p1025_p3  ;;  %p844_p8 = scmp.ne.s32.totalorder %s156_s16, %s843_s25 }
   0xb   : > { %p851_p11 = scmp.lt.s32.totalorder %s156_s16, %s156_s16  ;;  %p852_p12 = scmp.lt.s32.totalorder %s843_s25, %s843_s25 }
   0xc   : > { %p1033_p5 = pnand %p1021_p2, %p770_p4 }
   0xd   : > { %p853_p13 = por %p852_p12, %p851_p11 }
   0xe   : > { %p834_p7 = pneg %p1033_p5 }
  0x10   : > { %p846_p9 = pnand %p844_p8, %p834_p7 }
  0x12   : > { %p847_p10 = pneg %p846_p9 }
  0x14   : > { %p854_p0 = pnand %p853_p13, %p847_p10 }
  0x16   : > { %857 = shalt.err (!%p854_p0)
}
  0x17   : > { %s972_s26 = smov 128   ;;  %s973_s27 = smov 8  }
  0x18   : > { %776 = dma.hbm_to_vmem [thread:$0]  (!%p1033_p5), %s1166_s1, 256, %s156_s16, [#allocation8], %s972_s26, %s972_s26, %s973_s27  }
  0x19   : > { %s1177_s21 = smov (%p1038_p6, %s28_s21), 0  ;;  %s869_s30 = scalar_lea.vmem %s143_s24, 16 }
  0x1a   : > { %p870_p1 = scmp.ne.s32.totalorder %s143_s24, %s869_s30  ;;  %s876_s4 = scalar_lea.vmem %s143_s24, 32 }
  0x1b   : > { %p877_p9 = scmp.lt.s32.totalorder %s143_s24, %s143_s24  ;;  %p878_p10 = scmp.lt.s32.totalorder %s876_s4, %s869_s30 }
  0x1c   : > { %p872_p4 = pnand %p870_p1, %p834_p7 }
  0x1d   : > { %p879_p11 = por %p878_p10, %p877_p9 }
  0x1e   : > { %p873_p8 = pneg %p872_p4 }
  0x20   : > { %p880_p12 = pnand %p879_p11, %p873_p8 }
  0x22   : > { %883 = shalt.err (!%p880_p12)
}
  0x23   : > { %773 = dma.hbm_to_vmem [thread:$0]  (!%p1033_p5), %s1165_s0, 16, %s143_s24, [#allocation5]  }
  0x24   : > { %s974_s7 = smov [#allocation9]  }
  0x25   : > { %s168_s8 = sshll.u32 %s974_s7, 4  ;;  %s169_s8 = int_to_ptr.vmem [resolvable:$true] %s168_s8 }
  0x26   : > { %s895_s9 = scalar_lea.vmem %s169_s8, 2048  ;;  %p903_p1 = scmp.lt.s32.totalorder %s169_s8, %s169_s8 }
  0x27   : > { %p896_p6 = scmp.ne.s32.totalorder %s169_s8, %s895_s9  ;;  %p904_p4 = scmp.lt.s32.totalorder %s895_s9, %s895_s9 }
  0x29   : > { %p898_p13 = pnand %p896_p6, %p834_p7  ;;  %p905_p8 = por %p904_p4, %p903_p1 }
  0x2b   : > { %p899_p0 = pneg %p898_p13 }
  0x2d   : > { %p906_p9 = pnand %p905_p8, %p899_p0 }
  0x2f   : > { %909 = shalt.err (!%p906_p9)
}
  0x30   : > { %779 = dma.hbm_to_vmem [thread:$0]  (!%p1033_p5), %s1167_s2, 2048, %s169_s8, [#allocation8], %s972_s26, %s972_s26, %s973_s27  }
  0x31   : > { %184 = sbr.rel (%p1025_p3) target bundleno = 1081 (0x439), region = 32 }
  0x36   : > { %947 = dma.done.wait (%p1021_p2), [#allocation5], 16  }
  0x37   : > { %949 = vsyncadd (%p1021_p2), [#allocation5], 4294967280 }
  0x38   : > { %951 = dma.done.wait (%p1021_p2), [#allocation8], 2304  }
  0x39   : > { %953 = vsyncadd (%p1021_p2), [#allocation8], 4294964992  ;;  %v210_v0 = vlaneseq  ;;  %v1090_v2 = vld [vmem:[#allocation7] sm:$0xff]  ;;  %v1092_v3 = vld [vmem:[#allocation7 + $0x8] sm:$0xff]  ;;  %p662_p3 = scmp.ne.s32.totalorder %s960_s12, 0 }
  0x3a   : > { %v1094_v4 = vld [vmem:[#allocation4] ss:$0 sm:$0xff] }
  0x3b   : > { %v1088_v1 = vshrl.u32 %v210_v0, 7  ;;  %220 = sbr.rel (%p662_p3) target bundleno = 612 (0x264), region = 48 }
  0x3d   : > { %vm216_vm0 = vcmp.eq.s32.totalorder %v1088_v1, %v1094_v4 }
  0x40   : > { %v975_v5 = vmov 0.0   ;;  %vm976_vm1 = vmmov 0   ;;  %vm230_vm2 = vcmask 130048   ;;  %v977_v7 = vmov 32   ;;  %v333_v8 = vld [vmem:[#allocation9 + $0x78] sm:$0xff]  ;;  %v332_v9 = vld [vmem:[#allocation9 + $0x70] sm:$0xff] }
  0x41   : > { %226 = vst [vmem:[#allocation10] sm:$0xff] %v975_v5  ;;  %698 = vmatprep.subr.mxu0 %v975_v5  ;;  %702 = vmatprep.mubr.msk.f32.mxu0 %vm976_vm1, %v975_v5  ;;  %v663_v6 = vsel %vm216_vm0, 1.0, %v975_v5  ;;  %v331_v10 = vld [vmem:[#allocation9 + $0x68] sm:$0xff]  ;;  %v330_v11 = vld [vmem:[#allocation9 + $0x60] sm:$0xff]  ;;  %v329_v12 = vld [vmem:[#allocation9 + $0x58] sm:$0xff] }
  0x42   : > { %699 = vmatpush3.msra.mxu0 %v1092_v3  ;;  %705 = vmatprep.subr.mxu1 %v975_v5  ;;  %v328_v13 = vld [vmem:[#allocation9 + $0x50] sm:$0xff]  ;;  %v327_v14 = vld [vmem:[#allocation9 + $0x48] sm:$0xff]  ;;  %v326_v15 = vld [vmem:[#allocation9 + $0x40] sm:$0xff] }
  0x43   : > { %700 = vmatprep.subr.mxu0 %v975_v5  ;;  %737 = vmatprep.mubr.msk.f32.mxu1 %vm976_vm1, %v975_v5  ;;  %v325_v16 = vld [vmem:[#allocation9 + $0x38] sm:$0xff]  ;;  %v324_v17 = vld [vmem:[#allocation9 + $0x30] sm:$0xff]  ;;  %v323_v20 = vld [vmem:[#allocation9 + $0x28] sm:$0xff] }
  0x44   : > { %701 = vmatpush3.msra.mxu0 %v1090_v2  ;;  %823 = vset.pattern.permute.xlu0 %v977_v7  ;;  %v322_v22 = vld [vmem:[#allocation9 + $0x20] sm:$0xff]  ;;  %v321_v23 = vld [vmem:[#allocation9 + $0x18] sm:$0xff]  ;;  %v320_v24 = vld [vmem:[#allocation9 + $0x10] sm:$0xff] }
  0x45   : > { %703 = vmatmul.mubr.msk.f32.vlgmr.msra.gmra.mxu0 %vm230_vm2, %v663_v6  ;;  %706 = vmatpush3.msra.mxu1 %v333_v8  ;;  %v319_v25 = vld [vmem:[#allocation9 + $0x8] sm:$0xff]  ;;  %v318_v26 = vld [vmem:[#allocation9] sm:$0xff] }
  0x46   : > { %707 = vmatprep.subr.mxu1 %v975_v5 }
  0x47   : > { %708 = vmatpush3.msra.mxu1 %v332_v9 }
  0x48   : > { %709 = vmatprep.subr.mxu1 %v975_v5 }
  0x49   : > { %710 = vmatpush3.msra.mxu1 %v331_v10 }
  0x4a   : > { %711 = vmatprep.subr.mxu1 %v975_v5 }
  0x4b   : > { %712 = vmatpush3.msra.mxu1 %v330_v11 }
  0x4c   : > { %713 = vmatprep.subr.mxu1 %v975_v5 }
  0x4d   : > { %714 = vmatpush3.msra.mxu1 %v329_v12 }
  0x4e   : > { %715 = vmatprep.subr.mxu1 %v975_v5 }
  0x4f   : > { %716 = vmatpush3.msra.mxu1 %v328_v13 }
  0x50   : > { %717 = vmatprep.subr.mxu1 %v975_v5 }
  0x51   : > { %718 = vmatpush3.msra.mxu1 %v327_v14 }
  0x52   : > { %719 = vmatprep.subr.mxu1 %v975_v5 }
  0x53   : > { %720 = vmatpush3.msra.mxu1 %v326_v15 }
  0x54   : > { %721 = vmatprep.subr.mxu1 %v975_v5 }
  0x55   : > { %722 = vmatpush3.msra.mxu1 %v325_v16 }
  0x56   : > { %723 = vmatprep.subr.mxu1 %v975_v5 }
  0x57   : > { %724 = vmatpush3.msra.mxu1 %v324_v17 }
  0x58   : > { %725 = vmatprep.subr.mxu1 %v975_v5 }
  0x59   : > { %726 = vmatpush3.msra.mxu1 %v323_v20 }
  0x5a   : > { %727 = vmatprep.subr.mxu1 %v975_v5 }
  0x5b   : > { %728 = vmatpush3.msra.mxu1 %v322_v22 }
  0x5c   : > { %729 = vmatprep.subr.mxu1 %v975_v5 }
  0x5d   : > { %730 = vmatpush3.msra.mxu1 %v321_v23 }
  0x5e   : > { %731 = vmatprep.subr.mxu1 %v975_v5 }
  0x5f   : > { %732 = vmatpush3.msra.mxu1 %v320_v24 }
  0x60   : > { %733 = vmatprep.subr.mxu1 %v975_v5 }
  0x61   : > { %734 = vmatpush3.msra.mxu1 %v319_v25 }
  0x62   : > { %735 = vmatprep.subr.mxu1 %v975_v5 }
  0x63   : > { %736 = vmatpush3.msra.mxu1 %v318_v26 }
 0x105   : > { %v300_v18 = vpop.f32.mrf.mxu0 }
 0x106   : > { %v310_v19 = vmax.f32 %v300_v18, 1.0 }
 0x107   : > { %v704_v21 = vpop.f32.mrf.mxu0 }
 0x108   : > { %313 = vperm.xlu0 %823, %v310_v19  }
 0x183   : > { %v314_v27 = vpop.permute.xlu0 %313 }
 0x184   : > { %824 = vrcp.f32 %v314_v27 }
 0x191   : > { %v825_v28 = vpop.eup %824 }
 0x192   : > { %v317_v29 = vmul.f32 %v825_v28, %v300_v18 }
 0x194   : > { %738 = vmatmul.mubr.f32.vlgmr.msra.gmra.mxu1 %v317_v29 }
 0x254   : > { %v400_v30 = vpop.f32.mrf.mxu1 }
 0x255   : > { %826 = vtanh.f32 %v400_v30 }
 0x256   : > { %v739_v31 = vpop.f32.mrf.mxu1 }
 0x262   : > { %v827_v32 = vpop.eup %826 }
 0x263   : > { %405 = vst [vmem:[#allocation3] sm:$0xff] %v827_v32 }
 0x264 PF: > { %p665_p2 = scmp.ne.s32.totalorder %s960_s12, 1 }
 0x266   : > { %409 = sbr.rel (%p665_p2) target bundleno = 1066 (0x42a), region = 60 }
 0x26b   : > { %v978_v33 = vmov 0.0   ;;  %vm979_vm3 = vmmov 0   ;;  %v410_v34 = vld [vmem:[#allocation3] sm:$0xff]  ;;  %vm482_vm4 = vcmask 130048  }
 0x26c   : > { %740 = vmatprep.subr.mxu0 %v978_v33  ;;  %744 = vmatprep.mubr.msk.f32.mxu0 %vm979_vm3, %v978_v33  ;;  %v498_v51 = vld [vmem:[#allocation10] sm:$0xff] }
 0x26d   : > { %741 = vmatpush3.xpose.msra.mxu0 %v1092_v3  ;;  %747 = vmatprep.subr.mxu1 %v978_v33 }
 0x26e   : > { %742 = vmatprep.subr.mxu0 %v978_v33  ;;  %748 = vmatpush3.msra.mxu1 %v1092_v3 }
 0x26f   : > { %749 = vmatprep.subr.mxu1 %v978_v33  ;;  %751 = vmatprep.mubr.msk.f32.mxu1 %vm979_vm3, %v978_v33 }
 0x270   : > { %750 = vmatpush3.msra.mxu1 %v1090_v2 }
 0x271   : > { %743 = vmatpush3.xpose.msra.mxu0 %v1090_v2 }
 0x274   : > { %745 = vmatmul.mubr.f32.vlgmr.msra.gmra.mxu0 %v410_v34 }
 0x334   : > { %v477_v35 = vpop.f32.mrf.mxu0 }
 0x335   : > { %v481_v36 = vsel %vm216_vm0, %v477_v35, 0.0 }
 0x336   : > { %v483_v37 = vsel %vm482_vm4, %v481_v36, 0.0  ;;  %v746_v38 = vpop.f32.mrf.mxu0 }
 0x337   : > { %v484_v39 = vrot.slane %v483_v37, 4 }
 0x339   : > { %v485_v40 = vadd.f32 %v484_v39, %v483_v37 }
 0x33b   : > { %v486_v41 = vrot.slane %v485_v40, 2 }
 0x33d   : > { %v487_v42 = vadd.f32 %v486_v41, %v485_v40 }
 0x33f   : > { %v488_v43 = vrot.slane %v487_v42, 1 }
 0x341   : > { %v489_v44 = vadd.f32 %v488_v43, %v487_v42 }
 0x343   : > { %v666_v45 = vmul.f32 -10.0, %v489_v44 }
 0x345   : > { %v492_v46 = vmul.f32 1.442695, %v666_v45 }
 0x347   : > { %828 = vpow2.f32 %v492_v46 }
 0x354   : > { %v829_v47 = vpop.eup %828 }
 0x355   : > { %v494_v48 = vadd.f32 1.0, %v829_v47 }
 0x357   : > { %830 = vrcp.f32 %v494_v48 }
 0x364   : > { %v831_v49 = vpop.eup %830 }
 0x365   : > { %v497_v50 = vsel %vm216_vm0, %v831_v49, 0.0 }
 0x366   : > { %752 = vmatmul.mubr.msk.f32.vlgmr.msra.gmra.mxu1 %vm482_vm4, %v497_v50 }
 0x426   : > { %v568_v52 = vpop.f32.mrf.mxu1 }
 0x427   : > { %v572_v53 = vadd.f32 %v568_v52, %v498_v51 }
 0x428   : > { %v753_v54 = vpop.f32.mrf.mxu1 }
 0x429   : > { %573 = vst [vmem:[#allocation10] sm:$0xff] %v572_v53 }
 0x42a PF: > { %p1141_p5 = scmp.eq.s32.totalorder %s652_s17, 1  ;;  %s980_s15 = smov [#allocation10]  }
 0x42b   : > { %s581_s16 = sshll.u32 %s980_s15, 4  ;;  %s582_s16 = int_to_ptr.vmem [resolvable:$true] %s581_s16 }
 0x42c   : > { %s910_s18 = scalar_lea.vmem %s582_s16, 128  ;;  %p917_p12 = scmp.lt.s32.totalorder %s582_s16, %s582_s16 }
 0x42d   : > { %p911_p7 = scmp.ne.s32.totalorder %s582_s16, %s910_s18  ;;  %p918_p6 = scmp.lt.s32.totalorder %s910_s18, %s910_s18 }
 0x42f   : > { %p912_p10 = pnand %p911_p7, %p1141_p5  ;;  %p919_p13 = por %p918_p6, %p917_p12 }
 0x431   : > { %p913_p11 = pneg %p912_p10 }
 0x433   : > { %p920_p0 = pnand %p919_p13, %p913_p11 }
 0x435   : > { %923 = shalt.err (!%p920_p0)
}
 0x436   : > { %767 = dma.vmem_to_hbm [thread:$0]  (%p1141_p5), %s582_s16, 128, %s1168_s3, [#allocation6]  }
 0x437   : > { %955 = dma.done.wait (%p1141_p5), [#allocation6], 128  }
 0x438   : > { %957 = vsyncadd (%p1141_p5), [#allocation6], 4294967168 }
 0x439 PF: > { %s16_s14 = sadd.s32 1, %s968_s14   ;;  %s1174_s12 = smov %s964_s13 }
 0x43a   : > { %p13_p1 = scmp.ge.s32.totalorder %s16_s14, 4   ;;  %s1175_s13 = smov %s1177_s21 }
 0x43c   :  { %15 = sbr.rel (!%p13_p1) target bundleno = 4 (0x4), region = 87 }
 0x441   :  { %594 = vsyncpa [#allocation5], 1 }
 0x442   :  { %596 = vsyncpa [#allocation5 + $0x1], 1 }
 0x443   :  { %597 = vsyncpa [#allocation8], 1 }
 0x444   :  { %598 = vsyncpa [#allocation6], 1 }
 0x445   :  { %600 = vsyncpa [#allocation6 + $0x1], 1 }

</bundles_post_ra>
